<compile_context>
chip_gen: v7x
topology: tpu7x:2x2x1
jax: 0.10.0
libtpu: 0.0.40
codegen_flags: <defaults>
</compile_context>

<pallas_src>
import functools

import jax
import jax.numpy as jnp
from jax.experimental import pallas as pl
from jax.experimental.pallas import tpu as pltpu

L1, L2, L3 = 10, 20, 30  # hidden widths from the PyTorch module


def _round_up(n: int, m: int) -> int:
    return ((n + m - 1) // m) * m


def mlp_kernel(x_ref,
               w1_ref, b1_ref,
               w2_ref, b2_ref,
               w3_ref, b3_ref,
               w4_ref, b4_ref,
               out_ref):
    # MXU operand dtype follows the (possibly bf16) weights; accumulation is f32.
    cdt = w1_ref.dtype

    h = x_ref[...].astype(cdt)
    # fc_input: Linear(F -> 10) + ReLU
    h = jnp.maximum(
        jnp.dot(h, w1_ref[...], preferred_element_type=jnp.float32) + b1_ref[...], 0.0)
    # fc_l1: Linear(10 -> 20) + ReLU
    h = jnp.maximum(
        jnp.dot(h.astype(cdt), w2_ref[...], preferred_element_type=jnp.float32) + b2_ref[...], 0.0)
    # fc_l2: Linear(20 -> 30) + ReLU
    h = jnp.maximum(
        jnp.dot(h.astype(cdt), w3_ref[...], preferred_element_type=jnp.float32) + b3_ref[...], 0.0)
    # fc_output: Linear(30 -> C) + Sigmoid
    logits = jnp.dot(h.astype(cdt), w4_ref[...], preferred_element_type=jnp.float32) + b4_ref[...]
    out_ref[...] = jax.nn.sigmoid(logits).astype(out_ref.dtype)


@functools.partial(jax.jit, static_argnames=("block_batch",))
def neural_network_forward(x, params, *, block_batch=512):
    """x: (B, num_features). params: pre-transposed weights w_i (in, out), biases b_i (1, out)."""
    B, F = x.shape
    C = params["w4"].shape[1]

    # Batch tile: <= block_batch rows, multiple of 8 (sublane), pad B up to a tile multiple.
    TB = min(block_batch, _round_up(B, 8))
    Bp = _round_up(B, TB)
    if Bp != B:
        x = jnp.pad(x, ((0, Bp - B), (0, 0)))

    def pinned(arr):  # full-array block, constant index -> stays VMEM-resident across grid steps
        return pl.BlockSpec(arr.shape, lambda i: (0, 0))

    out = pl.pallas_call(
        mlp_kernel,
        out_shape=jax.ShapeDtypeStruct((Bp, C), jnp.float32),
        grid=(Bp // TB,),
        in_specs=[
            pl.BlockSpec((TB, F), lambda i: (i, 0)),
            pinned(params["w1"]), pinned(params["b1"]),
            pinned(params["w2"]), pinned(params["b2"]),
            pinned(params["w3"]), pinned(params["b3"]),
            pinned(params["w4"]), pinned(params["b4"]),
        ],
        out_specs=pl.BlockSpec((TB, C), lambda i: (i, 0)),
        compiler_params=pltpu.CompilerParams(
            dimension_semantics=("parallel",)),   # megacore sharding on v7x
    )(x,
      params["w1"], params["b1"],
      params["w2"], params["b2"],
      params["w3"], params["b3"],
      params["w4"], params["b4"])

    return out[:B] if Bp != B else out


def init_params(key, num_features, num_classes):
    """Torch-Linear-style init (uniform +/- 1/sqrt(fan_in)), stored PRE-TRANSPOSED:
    w_i has shape (in, out), b_i has shape (1, out)."""
    dims = [(num_features, L1), (L1, L2), (L2, L3), (L3, num_classes)]
    params = {}
    for i, (in_d, out_d) in enumerate(dims, start=1):
        key, kw, kb = jax.random.split(key, 3)
        bound = 1.0 / (in_d ** 0.5)
        params[f"w{i}"] = jax.random.uniform(kw, (in_d, out_d), jnp.float32, -bound, bound)
        params[f"b{i}"] = jax.random.uniform(kb, (1, out_d), jnp.float32, -bound, bound)
    return params


def cast_weights(params, dtype):
    """bf16 memory-bound path: cast only matmul operands; biases stay f32 (f32 accumulation)."""
    return {k: (v.astype(dtype) if k.startswith("w") else v) for k, v in params.items()}


def reference_forward(x, params):
    h = jnp.maximum(x @ params["w1"] + params["b1"], 0.0)
    h = jnp.maximum(h @ params["w2"] + params["b2"], 0.0)
    h = jnp.maximum(h @ params["w3"] + params["b3"], 0.0)
    return jax.nn.sigmoid(h @ params["w4"] + params["b4"])


if __name__ == "__main__":
    key = jax.random.PRNGKey(0)
    batch, num_features, num_classes = 8, 16, 4

    k_x, k_p, k_x2 = jax.random.split(key, 3)
    x = jax.random.normal(k_x, (batch, num_features), jnp.float32)
    params = init_params(k_p, num_features, num_classes)

    # --- f32 path, tiny batch (single tile) ---
    out = jax.block_until_ready(neural_network_forward(x, params))
    ref = reference_forward(x, params)
    assert out.shape == (batch, num_classes)
    assert jnp.allclose(out, ref, atol=1e-5, rtol=1e-5), "f32 mismatch vs JAX reference"

    # --- f32 path, batch not a multiple of the tile (exercises grid + padding) ---
    x_big = jax.random.normal(k_x2, (520, num_features), jnp.float32)
    out_big = jax.block_until_ready(neural_network_forward(x_big, params))
    assert jnp.allclose(out_big, reference_forward(x_big, params), atol=1e-5, rtol=1e-5), \
        "tiled f32 mismatch vs JAX reference"

    # --- bf16 operand path (halves HBM read of x), f32 accumulation, looser tolerance ---
    params_bf16 = cast_weights(params, jnp.bfloat16)
    out_bf16 = jax.block_until_ready(
        neural_network_forward(x_big.astype(jnp.bfloat16), params_bf16))
    assert jnp.allclose(out_bf16, reference_forward(x_big, params), atol=2e-2), \
        "bf16 mismatch vs f32 JAX reference"

    print("KERNEL_OK")
</pallas_src>

<mosaic_0001>
module attributes {stable_mosaic.version = 11 : i64} {
  func.func @mlp_kernel(%arg0: i32, %arg1: memref<8x16xf32, #tpu.memory_space<vmem>>, %arg2: memref<16x10xf32, #tpu.memory_space<vmem>>, %arg3: memref<1x10xf32, #tpu.memory_space<vmem>>, %arg4: memref<10x20xf32, #tpu.memory_space<vmem>>, %arg5: memref<1x20xf32, #tpu.memory_space<vmem>>, %arg6: memref<20x30xf32, #tpu.memory_space<vmem>>, %arg7: memref<1x30xf32, #tpu.memory_space<vmem>>, %arg8: memref<30x4xf32, #tpu.memory_space<vmem>>, %arg9: memref<1x4xf32, #tpu.memory_space<vmem>>, %arg10: memref<8x4xf32, #tpu.memory_space<vmem>>) attributes {dimension_semantics = [#tpu.dimension_semantics<parallel>], iteration_bounds = array<i64: 1>, scalar_prefetch = 0 : i64, scratch_operands = 0 : i64, tpu.core_type = #tpu.core_type<tc>, window_params = [{transform_indices = @transform_0, window_bounds = array<i64: 8, 16>}, {pipeline_mode = #tpu.pipeline_mode<synchronous>, transform_indices = @transform_1, window_bounds = array<i64: 16, 10>}, {pipeline_mode = #tpu.pipeline_mode<synchronous>, transform_indices = @transform_2, window_bounds = array<i64: 1, 10>}, {pipeline_mode = #tpu.pipeline_mode<synchronous>, transform_indices = @transform_3, window_bounds = array<i64: 10, 20>}, {pipeline_mode = #tpu.pipeline_mode<synchronous>, transform_indices = @transform_4, window_bounds = array<i64: 1, 20>}, {pipeline_mode = #tpu.pipeline_mode<synchronous>, transform_indices = @transform_5, window_bounds = array<i64: 20, 30>}, {pipeline_mode = #tpu.pipeline_mode<synchronous>, transform_indices = @transform_6, window_bounds = array<i64: 1, 30>}, {pipeline_mode = #tpu.pipeline_mode<synchronous>, transform_indices = @transform_7, window_bounds = array<i64: 30, 4>}, {pipeline_mode = #tpu.pipeline_mode<synchronous>, transform_indices = @transform_8, window_bounds = array<i64: 1, 4>}, {transform_indices = @transform_9, window_bounds = array<i64: 8, 4>}]} {
    %c0 = arith.constant 0 : index
    %c0_0 = arith.constant 0 : index
    %0 = vector.load %arg1[%c0, %c0_0] : memref<8x16xf32, #tpu.memory_space<vmem>>, vector<8x16xf32>
    %c0_1 = arith.constant 0 : index
    %c0_2 = arith.constant 0 : index
    %1 = vector.load %arg2[%c0_1, %c0_2] : memref<16x10xf32, #tpu.memory_space<vmem>>, vector<16x10xf32>
    %cst = arith.constant dense<0.000000e+00> : vector<8x10xf32>
    %2 = tpu.matmul %0, %1, %cst {dimension_numbers = #tpu.dot_dimension_numbers<[1], [0], [0], [1], [0, 0, 1, 1], [], []>} : vector<8x16xf32>, vector<16x10xf32>, vector<8x10xf32> -> vector<8x10xf32>
    %c0_3 = arith.constant 0 : index
    %c0_4 = arith.constant 0 : index
    %3 = vector.load %arg3[%c0_3, %c0_4] : memref<1x10xf32, #tpu.memory_space<vmem>>, vector<1x10xf32>
    %4 = vector.broadcast %3 : vector<1x10xf32> to vector<8x10xf32>
    %5 = arith.addf %2, %4 : vector<8x10xf32>
    %cst_5 = arith.constant 0.000000e+00 : f32
    %6 = vector.broadcast %cst_5 : f32 to vector<8x10xf32>
    %7 = arith.maximumf %5, %6 : vector<8x10xf32>
    %c0_6 = arith.constant 0 : index
    %c0_7 = arith.constant 0 : index
    %8 = vector.load %arg4[%c0_6, %c0_7] : memref<10x20xf32, #tpu.memory_space<vmem>>, vector<10x20xf32>
    %cst_8 = arith.constant dense<0.000000e+00> : vector<8x20xf32>
    %9 = tpu.matmul %7, %8, %cst_8 {dimension_numbers = #tpu.dot_dimension_numbers<[1], [0], [0], [1], [0, 0, 1, 1], [], []>} : vector<8x10xf32>, vector<10x20xf32>, vector<8x20xf32> -> vector<8x20xf32>
    %c0_9 = arith.constant 0 : index
    %c0_10 = arith.constant 0 : index
    %10 = vector.load %arg5[%c0_9, %c0_10] : memref<1x20xf32, #tpu.memory_space<vmem>>, vector<1x20xf32>
    %11 = vector.broadcast %10 : vector<1x20xf32> to vector<8x20xf32>
    %12 = arith.addf %9, %11 : vector<8x20xf32>
    %cst_11 = arith.constant 0.000000e+00 : f32
    %13 = vector.broadcast %cst_11 : f32 to vector<8x20xf32>
    %14 = arith.maximumf %12, %13 : vector<8x20xf32>
    %c0_12 = arith.constant 0 : index
    %c0_13 = arith.constant 0 : index
    %15 = vector.load %arg6[%c0_12, %c0_13] : memref<20x30xf32, #tpu.memory_space<vmem>>, vector<20x30xf32>
    %cst_14 = arith.constant dense<0.000000e+00> : vector<8x30xf32>
    %16 = tpu.matmul %14, %15, %cst_14 {dimension_numbers = #tpu.dot_dimension_numbers<[1], [0], [0], [1], [0, 0, 1, 1], [], []>} : vector<8x20xf32>, vector<20x30xf32>, vector<8x30xf32> -> vector<8x30xf32>
    %c0_15 = arith.constant 0 : index
    %c0_16 = arith.constant 0 : index
    %17 = vector.load %arg7[%c0_15, %c0_16] : memref<1x30xf32, #tpu.memory_space<vmem>>, vector<1x30xf32>
    %18 = vector.broadcast %17 : vector<1x30xf32> to vector<8x30xf32>
    %19 = arith.addf %16, %18 : vector<8x30xf32>
    %cst_17 = arith.constant 0.000000e+00 : f32
    %20 = vector.broadcast %cst_17 : f32 to vector<8x30xf32>
    %21 = arith.maximumf %19, %20 : vector<8x30xf32>
    %c0_18 = arith.constant 0 : index
    %c0_19 = arith.constant 0 : index
    %22 = vector.load %arg8[%c0_18, %c0_19] : memref<30x4xf32, #tpu.memory_space<vmem>>, vector<30x4xf32>
    %cst_20 = arith.constant dense<0.000000e+00> : vector<8x4xf32>
    %23 = tpu.matmul %21, %22, %cst_20 {dimension_numbers = #tpu.dot_dimension_numbers<[1], [0], [0], [1], [0, 0, 1, 1], [], []>} : vector<8x30xf32>, vector<30x4xf32>, vector<8x4xf32> -> vector<8x4xf32>
    %c0_21 = arith.constant 0 : index
    %c0_22 = arith.constant 0 : index
    %24 = vector.load %arg9[%c0_21, %c0_22] : memref<1x4xf32, #tpu.memory_space<vmem>>, vector<1x4xf32>
    %25 = vector.broadcast %24 : vector<1x4xf32> to vector<8x4xf32>
    %26 = arith.addf %23, %25 : vector<8x4xf32>
    %27 = arith.negf %26 : vector<8x4xf32>
    %28 = math.exp %27 : vector<8x4xf32>
    %cst_23 = arith.constant 1.000000e+00 : f32
    %29 = vector.broadcast %cst_23 : f32 to vector<8x4xf32>
    %30 = arith.addf %29, %28 : vector<8x4xf32>
    %31 = arith.divf %29, %30 : vector<8x4xf32>
    %c0_24 = arith.constant 0 : index
    %c0_25 = arith.constant 0 : index
    %32 = vector.load %arg10[%c0_24, %c0_25] : memref<8x4xf32, #tpu.memory_space<vmem>>, vector<8x4xf32>
    tpu.vector_store %arg10[%c0_24, %c0_25], %31 {strides = array<i32>} : memref<8x4xf32, #tpu.memory_space<vmem>>, vector<8x4xf32>,
    return
  }
  func.func @transform_0(%arg0: i32) -> (i32, i32) {
    %c0_i32 = arith.constant 0 : i32
    %c0_i32_0 = arith.constant 0 : i32
    return %arg0, %c0_i32 : i32, i32
  }
  func.func @transform_1(%arg0: i32) -> (i32, i32) {
    %c0_i32 = arith.constant 0 : i32
    %c0_i32_0 = arith.constant 0 : i32
    %c0_i32_1 = arith.constant 0 : i32
    return %c0_i32, %c0_i32_0 : i32, i32
  }
  func.func @transform_2(%arg0: i32) -> (i32, i32) {
    %c0_i32 = arith.constant 0 : i32
    %c0_i32_0 = arith.constant 0 : i32
    %c0_i32_1 = arith.constant 0 : i32
    return %c0_i32, %c0_i32_0 : i32, i32
  }
  func.func @transform_3(%arg0: i32) -> (i32, i32) {
    %c0_i32 = arith.constant 0 : i32
    %c0_i32_0 = arith.constant 0 : i32
    %c0_i32_1 = arith.constant 0 : i32
    return %c0_i32, %c0_i32_0 : i32, i32
  }
  func.func @transform_4(%arg0: i32) -> (i32, i32) {
    %c0_i32 = arith.constant 0 : i32
    %c0_i32_0 = arith.constant 0 : i32
    %c0_i32_1 = arith.constant 0 : i32
    return %c0_i32, %c0_i32_0 : i32, i32
  }
  func.func @transform_5(%arg0: i32) -> (i32, i32) {
    %c0_i32 = arith.constant 0 : i32
    %c0_i32_0 = arith.constant 0 : i32
    %c0_i32_1 = arith.constant 0 : i32
    return %c0_i32, %c0_i32_0 : i32, i32
  }
  func.func @transform_6(%arg0: i32) -> (i32, i32) {
    %c0_i32 = arith.constant 0 : i32
    %c0_i32_0 = arith.constant 0 : i32
    %c0_i32_1 = arith.constant 0 : i32
    return %c0_i32, %c0_i32_0 : i32, i32
  }
  func.func @transform_7(%arg0: i32) -> (i32, i32) {
    %c0_i32 = arith.constant 0 : i32
    %c0_i32_0 = arith.constant 0 : i32
    %c0_i32_1 = arith.constant 0 : i32
    return %c0_i32, %c0_i32_0 : i32, i32
  }
  func.func @transform_8(%arg0: i32) -> (i32, i32) {
    %c0_i32 = arith.constant 0 : i32
    %c0_i32_0 = arith.constant 0 : i32
    %c0_i32_1 = arith.constant 0 : i32
    return %c0_i32, %c0_i32_0 : i32, i32
  }
  func.func @transform_9(%arg0: i32) -> (i32, i32) {
    %c0_i32 = arith.constant 0 : i32
    %c0_i32_0 = arith.constant 0 : i32
    return %arg0, %c0_i32 : i32, i32
  }
}

</mosaic_0001>

<bundles_post_ra>
// kernel: neural_network_forward.1
= control target key start
LH: loop header
LB: loop body
LE: loop exit
PB: predicated region body
PF: predicated region fallthrough
CT: control target
= control target key end

     0   :  { %14 = vsyncpa [#allocation3], 0  ;;  %s732_s0 = inlined_call_operand.hbm [shape: f32[8,16], index: 0, kind: input, shape index: {}]   ;;  %s733_s1 = inlined_call_operand.vmem [shape: f32[16,10], index: 1, kind: input, shape index: {}]   ;;  %s734_s2 = inlined_call_operand.vmem [shape: f32[1,10], index: 2, kind: input, shape index: {}]   ;;  %s735_s3 = inlined_call_operand.vmem [shape: f32[10,20], index: 3, kind: input, shape index: {}]   ;;  %s736_s4 = inlined_call_operand.vmem [shape: f32[1,20], index: 4, kind: input, shape index: {}]   ;;  %s737_s5 = inlined_call_operand.vmem [shape: f32[20,30], index: 5, kind: input, shape index: {}]   ;;  %s738_s6 = inlined_call_operand.hbm [shape: f32[1,30], index: 6, kind: input, shape index: {}]   ;;  %s739_s7 = inlined_call_operand.vmem [shape: f32[30,4], index: 7, kind: input, shape index: {}]   ;;  %s740_s8 = inlined_call_operand.hbm [shape: f32[1,4], index: 8, kind: input, shape index: {}]   ;;  %s741_s9 = inlined_call_operand.vmem [shape: f32[8,4], index: 9, kind: output, shape index: {}]  }
   0x1   :  { %15 = vsyncpa [#allocation5], 0  ;;  %s591_s30 = smov [#allocation4]   ;;  %s592_s11 = smov [#allocation2]  }
   0x2   :  { %s42_s10 = sshll.u32 %s591_s30, 4  ;;  %s22_s12 = sshll.u32 %s592_s11, 4  ;;  %s43_s10 = int_to_ptr.vmem [resolvable:$true] %s42_s10  ;;  %s23_s12 = int_to_ptr.vmem [resolvable:$true] %s22_s12 }
   0x3   :  { %s521_s15 = scalar_lea.hbm %s738_s6, 16 }
   0x4   :  { %p522_p0 = scmp.ne.s32.totalorder %s738_s6, %s521_s15  ;;  %p525_p1 = scmp.lt.u32.totalorder %s521_s15, %s738_s6 }
   0x6   :  { %p527_p2 = pnand %p525_p1, %p522_p0 }
   0x8   :  { %530 = shalt.err (!%p527_p2)
}
   0x9   :  { %s531_s20 = scalar_lea.vmem %s43_s10, 16  ;;  %s535_s21 = scalar_lea.vmem %s43_s10, 32 }
   0xa   :  { %p532_p3 = scmp.ne.s32.totalorder %s43_s10, %s531_s20  ;;  %p536_p4 = scmp.lt.s32.totalorder %s43_s10, %s43_s10 }
   0xb   :  { %p537_p5 = scmp.lt.s32.totalorder %s535_s21, %s531_s20 }
   0xd   :  { %p538_p6 = por %p537_p5, %p536_p4 }
   0xf   :  { %p539_p7 = pnand %p538_p6, %p532_p3 }
  0x11   :  { %542 = shalt.err (!%p539_p7)
}
  0x12   :  { %45 = dma.hbm_to_vmem [thread:$0]  %s738_s6, 16, %s43_s10, [#allocation5]  }
  0x13   :  { %s543_s26 = scalar_lea.hbm %s732_s0, 128 }
  0x14   :  { %p544_p8 = scmp.ne.s32.totalorder %s732_s0, %s543_s26  ;;  %p547_p9 = scmp.lt.u32.totalorder %s543_s26, %s732_s0 }
  0x16   :  { %p549_p10 = pnand %p547_p9, %p544_p8 }
  0x18   :  { %552 = shalt.err (!%p549_p10)
}
  0x19   :  { %s553_s11 = scalar_lea.vmem %s23_s12, 128  ;;  %p558_p12 = scmp.lt.s32.totalorder %s23_s12, %s23_s12 }
  0x1a   :  { %p554_p11 = scmp.ne.s32.totalorder %s23_s12, %s553_s11  ;;  %p559_p13 = scmp.lt.s32.totalorder %s553_s11, %s553_s11 }
  0x1c   :  { %p560_p0 = por %p559_p13, %p558_p12 }
  0x1e   :  { %p561_p1 = pnand %p560_p0, %p554_p11 }
  0x20   :  { %564 = shalt.err (!%p561_p1)
}
  0x21   :  { %25 = dma.hbm_to_vmem [thread:$0]  %s732_s0, 128, %s23_s12, [#allocation3]  }
  0x22   :  { %s593_s13 = smov [#allocation6]   ;;  %s565_s17 = scalar_lea.hbm %s740_s8, 16 }
  0x23   :  { %s54_s14 = sshll.u32 %s593_s13, 4  ;;  %p566_p2 = scmp.ne.s32.totalorder %s740_s8, %s565_s17  ;;  %s55_s14 = int_to_ptr.vmem [resolvable:$true] %s54_s14 }
  0x24   :  { %p569_p3 = scmp.lt.u32.totalorder %s565_s17, %s740_s8 }
  0x26   :  { %p571_p4 = pnand %p569_p3, %p566_p2 }
  0x28   :  { %574 = shalt.err (!%p571_p4)
}
  0x29   :  { %s575_s22 = scalar_lea.vmem %s55_s14, 16  ;;  %s579_s0 = scalar_lea.vmem %s55_s14, 32 }
  0x2a   :  { %p576_p5 = scmp.ne.s32.totalorder %s55_s14, %s575_s22  ;;  %p580_p6 = scmp.lt.s32.totalorder %s55_s14, %s55_s14 }
  0x2b   :  { %p581_p7 = scmp.lt.s32.totalorder %s579_s0, %s575_s22 }
  0x2d   :  { %p582_p8 = por %p581_p7, %p580_p6 }
  0x2f   :  { %p583_p9 = pnand %p582_p8, %p576_p5 }
  0x31   :  { %586 = shalt.err (!%p583_p9)
}
  0x32   :  { %57 = dma.hbm_to_vmem [thread:$0]  %s740_s8, 16, %s55_s14, [#allocation5]  }
  0x33   :  { %587 = dma.done.wait [#allocation3], 128  }
  0x34   :  { %588 = vsyncadd [#allocation3], 4294967168 }
  0x35   :  { %589 = dma.done.wait [#allocation5], 32  }
  0x36   :  { %590 = vsyncadd [#allocation5], 4294967264  ;;  %v594_v0 = vmov 0.0|0.0   ;;  %vm595_vm0 = vmmov 0   ;;  %v596_v1 = vmov 0.0   ;;  %v68_v2 = vld [vmem:[%s733_s1] sm:$0xff] }
  0x37   :  { %493 = vmatprep.subr.bf16.mxu0 %v594_v0  ;;  %463 = vmatprep.mubr.msk.f32.mxu0 %vm595_vm0, %v596_v1  ;;  %v69_v3 = vld [vmem:[%s733_s1 + $0x8] sm:$0xff]  ;;  %v67_v5 = vld [vmem:[#allocation2] sm:$0xff]  ;;  %vm77_vm1 = vcmask 130048   ;;  %vm165_vm2 = vcmask 1041408   ;;  %vm597_vm3 = vmmov 1   ;;  %vm161_vm5 = vcmask 80896  }
  0x38   :  { %496 = vmatprep.subr.bf16.mxu1 %v594_v0  ;;  %470 = vmatprep.mubr.msk.f32.mxu1 %vm595_vm0, %v596_v1  ;;  %v494_v4 = vpack.c.bf16 %v69_v3, %v68_v2  ;;  %v152_v6 = vld [vmem:[%s735_s3] sm:$0xff]  ;;  %v153_v7 = vld [vmem:[%s735_s3 + $0x8] sm:$0x3]  ;;  %vm498_vm4 = vmpackc.low %vm165_vm2, %vm597_vm3  ;;  %vm254_vm6 = vcmask 1043456   ;;  %vm250_vm7 = vcmask 162816   ;;  %vm344_vm8 = vcmask 1045504  }
  0x39   :  { %v497_v8 = vpack.c.bf16 %v153_v7, %v152_v6  ;;  %v240_v9 = vld [vmem:[%s737_s5] sm:$0xff]  ;;  %v241_v10 = vld [vmem:[%s737_s5 + $0x8] sm:$0xff]  ;;  %v242_v17 = vld [vmem:[%s737_s5 + $0x10] sm:$0xf]  ;;  %vm340_vm10 = vcmask 244736   ;;  %vm424_vm11 = vcmask 31744  }
  0x3a   :  { %495 = vmatpush3.bf16.msra.mxu0 %v494_v4  ;;  %v501_v11 = vpack.c.bf16 %v241_v10, %v240_v9  ;;  %v432_v12 = vld [vmem:[%s734_s2] ss:$0 sm:$0xff]  ;;  %v330_v19 = vld [vmem:[%s739_s7 + $0x8] sm:$0xff]  ;;  %vm508_vm9 = vmpackc.low %vm344_vm8, %vm597_vm3 }
  0x3b   :  { %500 = vmatprep.subr.bf16.mxu0 %v594_v0  ;;  %499 = vmatpush3.bf16.msk.msra.mxu1 %vm498_vm4, %v497_v8  ;;  %v329_v18 = vld [vmem:[%s739_s7] sm:$0xff]  ;;  %v331_v26 = vld [vmem:[%s739_s7 + $0x10] sm:$0xff]  ;;  %v332_v27 = vld [vmem:[%s739_s7 + $0x18] sm:$0x3f] }
  0x3c   :  { %503 = vmatprep.subr.bf16.mxu1 %v594_v0  ;;  %v504_v20 = vpack.c.bf16 %v330_v19, %v329_v18  ;;  %v434_v21 = vld [vmem:[%s736_s4] ss:$0 sm:$0xff]  ;;  %v507_v28 = vpack.c.bf16 %v332_v27, %v331_v26  ;;  %v437_v29 = vld [vmem:[#allocation4] ss:$0 sm:$0xff]  ;;  %v440_v34 = vld [vmem:[#allocation6] ss:$0 sm:$0xff] }
  0x3d   :  { %464 = vmatmul.mubr.msk.f32.vlgmr.msra.gmra.mrb[0].mxu0 %vm77_vm1, %v67_v5 }
  0x3e   :  { %479 = vmatprep.mubr.msk.f32.mxu0 %vm595_vm0, %v596_v1  ;;  %502 = vmatpush3.bf16.msra.mxu0 %v501_v11 }
  0x3f   :  { %477 = vmatprep.subr.mxu0 %v596_v1 }
  0x42   :  { %478 = vmatpush3.msk.msra.mxu0 %vm254_vm6, %v242_v17 }
 0x110   :  { %v147_v13 = vpop.f32.mrb[0].mxu0 }
 0x111   :  { %v148_v14 = vadd.f32 %v432_v12, %v147_v13  ;;  %v465_v15 = vpop.f32.mrb[1].mxu0 }
 0x113   :  { %v151_v16 = vmax.f32 %v148_v14, 0.0 }
 0x115   :  { %471 = vmatmul.mubr.msk.f32.vlgmr.msra.gmra.mrb[0].mxu1 %vm161_vm5, %v151_v16 }
 0x116   :  { %490 = vmatprep.mubr.msk.f32.mxu1 %vm595_vm0, %v596_v1  ;;  %505 = vmatpush3.bf16.msra.mxu1 %v504_v20 }
 0x117   :  { %506 = vmatprep.subr.bf16.mxu1 %v594_v0 }
 0x11a   :  { %509 = vmatpush3.bf16.msk.msra.mxu1 %vm508_vm9, %v507_v28 }
 0x1e8   :  { %v235_v22 = vpop.f32.mrb[0].mxu1 }
 0x1e9   :  { %v236_v23 = vadd.f32 %v434_v21, %v235_v22  ;;  %v472_v24 = vpop.f32.mrb[1].mxu1 }
 0x1eb   :  { %v239_v25 = vmax.f32 %v236_v23, 0.0 }
 0x1ed   :  { %480 = vmatmul.mubr.msk.f32.vlgmr.msra.gmra.mrb[2].mxu0 %vm250_vm7, %v239_v25 }
 0x2c0   :  { %v324_v30 = vpop.f32.mrb[2].mxu0 }
 0x2c1   :  { %v325_v31 = vadd.f32 %v437_v29, %v324_v30  ;;  %v481_v32 = vpop.f32.mrb[3].mxu0 }
 0x2c3   :  { %v328_v33 = vmax.f32 %v325_v31, 0.0 }
 0x2c5   :  { %491 = vmatmul.mubr.msk.f32.vlgmr.msra.gmra.mrb[2].mxu1 %vm340_vm10, %v328_v33 }
 0x398   :  { %v414_v35 = vpop.f32.mrb[2].mxu1 }
 0x399   :  { %v415_v36 = vadd.f32 %v440_v34, %v414_v35  ;;  %v492_v37 = vpop.f32.mrb[3].mxu1 }
 0x39b   :  { %v443_v38 = vmul.f32 -1.442695, %v415_v36 }
 0x39d   :  { %517 = vpow2.f32 %v443_v38 }
 0x3a7   :  { %v518_v39 = vpop.eup %517 }
 0x3a8   :  { %v421_v40 = vadd.f32 1.0, %v518_v39 }
 0x3aa   :  { %519 = vrcp.f32 %v421_v40 }
 0x3b4   :  { %v520_v41 = vpop.eup %519 }
 0x3b5   :  { %425 = vst.msk [vmem:[%s741_s9] sm:$0xff] %vm424_vm11, %v520_v41 }
 0x3b6   :  { %430 = vsyncpa [#allocation3], 1 }
 0x3b7   :  { %431 = vsyncpa [#allocation5], 1 }

</bundles_post_ra>
